<compile_context>
chip_gen: v6e
topology: v6e:2x2x1
jax: 0.10.0
libtpu: 0.0.40
codegen_flags: <defaults>
</compile_context>

<pallas_src>
import functools

import jax
import jax.numpy as jnp
from jax.experimental import pallas as pl
from jax.experimental.pallas import tpu as pltpu

_LANE = 128
_VMEM_LIMIT_BYTES = 48 * 1024 * 1024      # <= 64 MiB physical on v7x; fine on v5e/v6e
_RESIDENT_XW_BYTES = 24 * 1024 * 1024     # budget for keeping XW fully VMEM-resident


def _round_up(x, m):
    return (x + m - 1) // m * m


def _pad_to(arr, shape):
    return jnp.pad(arr, [(0, t - s) for s, t in zip(arr.shape, shape)])


def _padded_rows(n):
    """Pad node count to a multiple of 128; allow extra padding only when it buys a
    >=256-row tile at <=10% extra A_hat traffic/compute (A_hat cost ~ n_pad^2)."""
    n128 = _round_up(n, _LANE)
    for cand in (512, 384, 256):
        padded = _round_up(n128, cand)
        if padded * padded * 10 <= n128 * n128 * 11:
            return padded
    return n128


def _tiles_for(n_pad):
    """Row tile tm and reduction tile tk; both EXACT divisors of n_pad (fixes the old
    row-dropping bug), tm halved if needed so the parallel row axis has >=2 iterations
    for v7x megacore."""
    tm = _LANE
    for cand in (512, 384, 256, 128):
        if cand <= n_pad and n_pad % cand == 0:
            tm = cand
            break
    while tm > _LANE and n_pad // tm < 2:
        tm //= 2          # tm/2 still divides n_pad and remains a multiple of 8
    tk = _LANE
    for cand in (1024, 512, 256, 128):
        if cand <= n_pad and n_pad % cand == 0:
            tk = cand
            break
    return tm, tk


def _xw_fits_vmem(n_pad, d):
    # Conservative: assume the pipeline may double-buffer the resident bf16 operand.
    return 2 * n_pad * d * 2 <= _RESIDENT_XW_BYTES


# --------------------------------------------------------------------------- #
# Kernels
# --------------------------------------------------------------------------- #
def _transform_kernel(x_ref, w_ref, o_ref):
    """One row-tile of XW = X @ W (bf16 operands, f32 accumulate)."""
    o_ref[...] = jnp.dot(
        x_ref[...], w_ref[...], preferred_element_type=jnp.float32
    ).astype(o_ref.dtype)


def _acc_step(a_ref, xw_ref, acc_ref, *, xw_resident, tk):
    """acc += A_hat_tile @ XW_tile, with init at k==0."""
    k = pl.program_id(1)

    @pl.when(k == 0)
    def _init():
        acc_ref[...] = jnp.zeros_like(acc_ref)

    if xw_resident:
        start = pl.multiple_of(k * tk, tk)
        xw = xw_ref[pl.ds(start, tk), :]          # VMEM-resident operand, sliced per k
    else:
        xw = xw_ref[...]                          # streamed (tk, d) tile
    acc_ref[...] += jnp.dot(a_ref[...], xw, preferred_element_type=jnp.float32)


def _agg_fused_kernel(a_ref, xw_ref, b_ref, w2_ref, o_ref, acc_ref, *,
                      xw_resident, tk):
    """Layer-1 aggregation with fused layer-2 feature transform:
       at k==last store relu(acc + b1) @ W2 (bf16)."""
    _acc_step(a_ref, xw_ref, acc_ref, xw_resident=xw_resident, tk=tk)

    @pl.when(pl.program_id(1) == pl.num_programs(1) - 1)
    def _finalize():
        h1 = jnp.maximum(acc_ref[...] + b_ref[...], 0.0)       # f32 epilogue
        o_ref[...] = jnp.dot(
            h1.astype(jnp.bfloat16), w2_ref[...],
            preferred_element_type=jnp.float32,
        ).astype(o_ref.dtype)


def _agg_bias_kernel(a_ref, xw_ref, b_ref, o_ref, acc_ref, *, xw_resident, tk):
    """Layer-2 aggregation: at k==last store acc + b2 (no activation)."""
    _acc_step(a_ref, xw_ref, acc_ref, xw_resident=xw_resident, tk=tk)

    @pl.when(pl.program_id(1) == pl.num_programs(1) - 1)
    def _finalize():
        o_ref[...] = (acc_ref[...] + b_ref[...]).astype(o_ref.dtype)


# --------------------------------------------------------------------------- #
# pallas_call wrappers
# --------------------------------------------------------------------------- #
def _feature_transform(x_bf16, w_bf16, tm):
    """XW = X @ W, row-tiled.  x:[Np, Fp] bf16, w:[Fp, D] bf16 -> [Np, D] bf16."""
    n_pad, f_pad = x_bf16.shape
    d = w_bf16.shape[1]
    return pl.pallas_call(
        _transform_kernel,
        out_shape=jax.ShapeDtypeStruct((n_pad, d), jnp.bfloat16),
        grid=(n_pad // tm,),
        in_specs=[
            pl.BlockSpec((tm, f_pad), lambda i: (i, 0)),
            pl.BlockSpec((f_pad, d), lambda i: (0, 0)),
        ],
        out_specs=pl.BlockSpec((tm, d), lambda i: (i, 0)),
        compiler_params=pltpu.CompilerParams(
            dimension_semantics=("parallel",),
            vmem_limit_bytes=_VMEM_LIMIT_BYTES,
        ),
    )(x_bf16, w_bf16)


def _aggregate(a_bf16, xw_bf16, bias_f32, tm, tk, *, w2_bf16=None, out_dtype):
    """OUT = A_hat @ XW (+ bias / relu / fused @W2), tiled over (row, reduction) with a
    VMEM f32 accumulator.  XW is kept fully VMEM-resident when it fits the budget."""
    n_pad = a_bf16.shape[0]
    d = xw_bf16.shape[1]
    d_out = w2_bf16.shape[1] if w2_bf16 is not None else d
    grid = (n_pad // tm, n_pad // tk)
    resident = _xw_fits_vmem(n_pad, d)

    if resident:
        # Constant index_map -> DMA'd into VMEM once, no per-row-tile re-streaming.
        xw_spec = pl.BlockSpec((n_pad, d), lambda i, k: (0, 0))
    else:
        xw_spec = pl.BlockSpec((tk, d), lambda i, k: (k, 0))

    in_specs = [
        pl.BlockSpec((tm, tk), lambda i, k: (i, k)),   # A_hat tile (dominant HBM stream)
        xw_spec,                                       # transformed features
        pl.BlockSpec((1, d), lambda i, k: (0, 0)),     # bias (broadcast)
    ]
    operands = [a_bf16, xw_bf16, bias_f32]

    if w2_bf16 is not None:
        in_specs.append(pl.BlockSpec(w2_bf16.shape, lambda i, k: (0, 0)))  # resident W2
        operands.append(w2_bf16)
        kernel = functools.partial(_agg_fused_kernel, xw_resident=resident, tk=tk)
        flops = 2 * n_pad * n_pad * d + 2 * n_pad * d * d_out
    else:
        kernel = functools.partial(_agg_bias_kernel, xw_resident=resident, tk=tk)
        flops = 2 * n_pad * n_pad * d

    xw_reads = 1 if resident else (n_pad // tm)
    bytes_accessed = (
        n_pad * n_pad * 2                                   # A_hat (bf16)
        + xw_reads * n_pad * d * 2                          # XW (bf16)
        + d * 4                                             # bias
        + n_pad * d_out * jnp.dtype(out_dtype).itemsize     # output
    )

    return pl.pallas_call(
        kernel,
        out_shape=jax.ShapeDtypeStruct((n_pad, d_out), out_dtype),
        grid=grid,
        in_specs=in_specs,
        out_specs=pl.BlockSpec((tm, d_out), lambda i, k: (i, 0)),
        scratch_shapes=[pltpu.VMEM((tm, d), jnp.float32)],
        compiler_params=pltpu.CompilerParams(
            dimension_semantics=("parallel", "arbitrary"),
            vmem_limit_bytes=_VMEM_LIMIT_BYTES,
        ),
        cost_estimate=pl.CostEstimate(
            flops=flops, transcendentals=0, bytes_accessed=bytes_accessed),
    )(*operands)


# --------------------------------------------------------------------------- #
# Glue (plain JAX)
# --------------------------------------------------------------------------- #
def gcn_normalize(edge_index, num_nodes, dtype=jnp.float32):
    """Dense symmetric GCN normalization: D^{-1/2} (A + I) D^{-1/2}.

    Matches PyG gcn_norm for undirected, duplicate-free edge_index without self loops.
    # TODO(synk): directed graphs / duplicate edges / pre-existing self loops deviate
    # slightly from PyG's scatter-based gcn_norm; dense N^2 form kept for the kernel.
    """
    src, dst = edge_index[0], edge_index[1]
    adj = jnp.zeros((num_nodes, num_nodes), dtype=dtype)
    adj = adj.at[src, dst].add(1.0)
    adj = adj + jnp.eye(num_nodes, dtype=dtype)
    deg = jnp.sum(adj, axis=1)
    d_inv_sqrt = jnp.where(deg > 0, 1.0 / jnp.sqrt(deg), 0.0)
    return adj * d_inv_sqrt[:, None] * d_inv_sqrt[None, :]


def prepare_a_hat(edge_index, num_nodes):
    """Build + normalize + pad + bf16-cast A_hat ONCE (this is what CachedGCNConv caches);
    reuse the result across gnn_forward calls."""
    n_pad = _padded_rows(num_nodes)
    a_hat = gcn_normalize(edge_index, num_nodes, dtype=jnp.float32)
    return _pad_to(a_hat, (n_pad, n_pad)).astype(jnp.bfloat16)


def gnn_forward(x, a_hat_pad, params):
    """Two-layer GCN forward (UDAGCN GNN, type='gcn'), Pallas-tiled.

    a_hat_pad: output of prepare_a_hat (padded, bf16, cached across calls).
    """
    n, f = x.shape
    n_pad = a_hat_pad.shape[0]
    w1, b1, w2, b2 = params["w1"], params["b1"], params["w2"], params["b2"]
    hidden = w1.shape[1]
    enc = w2.shape[1]

    tm, tk = _tiles_for(n_pad)
    f_pad = _round_up(f, _LANE)
    hidden_pad = _round_up(hidden, _LANE)
    enc_pad = _round_up(enc, _LANE)

    # Zero padding to 128-lane multiples is exact (contributes nothing to the matmuls).
    x_p = _pad_to(x, (n_pad, f_pad)).astype(jnp.bfloat16)
    w1_p = _pad_to(w1, (f_pad, hidden_pad)).astype(jnp.bfloat16)
    b1_p = _pad_to(b1.reshape(1, -1), (1, hidden_pad)).astype(jnp.float32)
    w2_p = _pad_to(w2, (hidden_pad, enc_pad)).astype(jnp.bfloat16)
    b2_p = _pad_to(b2.reshape(1, -1), (1, enc_pad)).astype(jnp.float32)

    # ---- layer 1 (+ fused layer-2 feature transform) -------------------------
    # XW1 = X @ W1 ; HW2 = relu(A_hat @ XW1 + b1) @ W2   (H1 never round-trips HBM)
    xw1 = _feature_transform(x_p, w1_p, tm)                       # [Np, 128] bf16
    hw2 = _aggregate(a_hat_pad, xw1, b1_p, tm, tk,
                     w2_bf16=w2_p, out_dtype=jnp.bfloat16)        # [Np, enc_pad] bf16
    # TODO(synk): nn.Dropout(0.1) between layers in training mode; identity here
    # (eval / deterministic semantics).

    # ---- layer 2: OUT = A_hat @ HW2 + b2 -------------------------------------
    out = _aggregate(a_hat_pad, hw2, b2_p, tm, tk,
                     w2_bf16=None, out_dtype=jnp.float32)         # [Np, enc_pad] f32

    return out[:n, :enc]


def gnn_reference(x, edge_index, params):
    """Pure-JAX f32 reference (eval-mode dropout)."""
    n = x.shape[0]
    a_hat = gcn_normalize(edge_index, n, dtype=jnp.float32)
    h1 = jnp.maximum(a_hat @ (x @ params["w1"]) + params["b1"], 0.0)
    return a_hat @ (h1 @ params["w2"]) + params["b2"]


def init_params(key, num_features, hidden, encoder_dim):
    """Deterministic glorot-style init matching CachedGCNConv parameter shapes."""
    k1, k2 = jax.random.split(key)

    def glorot(k, fan_in, fan_out):
        limit = jnp.sqrt(6.0 / (fan_in + fan_out))
        return jax.random.uniform(k, (fan_in, fan_out), jnp.float32, -limit, limit)

    return {
        "w1": glorot(k1, num_features, hidden),
        "b1": jnp.zeros((hidden,), jnp.float32),
        "w2": glorot(k2, hidden, encoder_dim),
        "b2": jnp.zeros((encoder_dim,), jnp.float32),
    }


if __name__ == "__main__":
    key = jax.random.PRNGKey(0)
    kx, kp = jax.random.split(key)

    num_nodes = 64
    num_features = 32
    hidden = 128          # fixed by the module
    encoder_dim = 16

    x = jax.random.normal(kx, (num_nodes, num_features), dtype=jnp.float32)

    # Deterministic small graph: ring edges (both directions).
    idx = jnp.arange(num_nodes, dtype=jnp.int32)
    src = jnp.concatenate([idx, (idx + 1) % num_nodes])
    dst = jnp.concatenate([(idx + 1) % num_nodes, idx])
    edge_index = jnp.stack([src, dst], axis=0)  # [2, 2N]

    params = init_params(kp, num_features, hidden, encoder_dim)

    # A_hat is normalized/padded/cast once and reused (CachedGCNConv caching).
    a_hat_pad = prepare_a_hat(edge_index, num_nodes)

    out = gnn_forward(x, a_hat_pad, params)
    jax.block_until_ready(out)

    assert out.shape == (num_nodes, encoder_dim)
    assert out.dtype == jnp.float32
    assert bool(jnp.all(jnp.isfinite(out)))

    # Tolerance check vs. f32 reference (bf16 operands, f32 accumulation).
    ref = gnn_reference(x, edge_index, params)
    max_err = float(jnp.max(jnp.abs(out - ref)))
    assert max_err < 0.1, f"max abs error {max_err} vs f32 reference"

    print("KERNEL_OK")
</pallas_src>

<mosaic_0001>
module attributes {stable_mosaic.version = 11 : i64} {
  func.func @_transform_kernel(%arg0: i32, %arg1: memref<128x128xbf16, #tpu.memory_space<vmem>>, %arg2: memref<128x128xbf16, #tpu.memory_space<vmem>>, %arg3: memref<128x128xbf16, #tpu.memory_space<vmem>>) attributes {dimension_semantics = [#tpu.dimension_semantics<parallel>], iteration_bounds = array<i64: 1>, scalar_prefetch = 0 : i64, scratch_operands = 0 : i64, tpu.core_type = #tpu.core_type<tc>, window_params = [{transform_indices = @transform_0, window_bounds = array<i64: 128, 128>}, {pipeline_mode = #tpu.pipeline_mode<synchronous>, transform_indices = @transform_1, window_bounds = array<i64: 128, 128>}, {transform_indices = @transform_2, window_bounds = array<i64: 128, 128>}]} {
    %c0 = arith.constant 0 : index
    %c0_0 = arith.constant 0 : index
    %0 = vector.load %arg1[%c0, %c0_0] : memref<128x128xbf16, #tpu.memory_space<vmem>>, vector<128x128xbf16>
    %c0_1 = arith.constant 0 : index
    %c0_2 = arith.constant 0 : index
    %1 = vector.load %arg2[%c0_1, %c0_2] : memref<128x128xbf16, #tpu.memory_space<vmem>>, vector<128x128xbf16>
    %cst = arith.constant dense<0.000000e+00> : vector<128x128xf32>
    %2 = tpu.matmul %0, %1, %cst {dimension_numbers = #tpu.dot_dimension_numbers<[1], [0], [0], [1], [0, 0, 1, 1], [], []>} : vector<128x128xbf16>, vector<128x128xbf16>, vector<128x128xf32> -> vector<128x128xf32>
    %3 = arith.truncf %2 : vector<128x128xf32> to vector<128x128xbf16>
    %c0_3 = arith.constant 0 : index
    %c0_4 = arith.constant 0 : index
    %4 = vector.load %arg3[%c0_3, %c0_4] : memref<128x128xbf16, #tpu.memory_space<vmem>>, vector<128x128xbf16>
    tpu.vector_store %arg3[%c0_3, %c0_4], %3 {strides = array<i32>} : memref<128x128xbf16, #tpu.memory_space<vmem>>, vector<128x128xbf16>,
    return
  }
  func.func @transform_0(%arg0: i32) -> (i32, i32) {
    %c0_i32 = arith.constant 0 : i32
    %c0_i32_0 = arith.constant 0 : i32
    return %arg0, %c0_i32 : i32, i32
  }
  func.func @transform_1(%arg0: i32) -> (i32, i32) {
    %c0_i32 = arith.constant 0 : i32
    %c0_i32_0 = arith.constant 0 : i32
    %c0_i32_1 = arith.constant 0 : i32
    return %c0_i32, %c0_i32_0 : i32, i32
  }
  func.func @transform_2(%arg0: i32) -> (i32, i32) {
    %c0_i32 = arith.constant 0 : i32
    %c0_i32_0 = arith.constant 0 : i32
    return %arg0, %c0_i32 : i32, i32
  }
}

</mosaic_0001>

<bundles_post_ra>
// kernel: tpu_custom_call.1
= control target key start
LH: loop header
LB: loop body
LE: loop exit
PB: predicated region body
PF: predicated region fallthrough
CT: control target
= control target key end

     0   :  { %7 = vsyncpa [#allocation3], 0  ;;  %s648_s0 = inlined_call_operand.hbm [shape: bf16[128,128], index: 0, kind: input, shape index: {}]   ;;  %s649_s1 = inlined_call_operand.hbm [shape: bf16[128,128], index: 1, kind: input, shape index: {}]   ;;  %s650_s2 = inlined_call_operand.hbm [shape: bf16[128,128], index: 2, kind: output, shape index: {}]  }
   0x1   :  { %8 = vsyncpa [#allocation6], 0 }
   0x2   :  { %9 = vsyncpa [#allocation4], 0  ;;  %s610_s9 = smov [#allocation2]  }
   0x3   :  { %s15_s10 = sshll.u32 %s610_s9, 4  ;;  %s16_s10 = int_to_ptr.vmem [resolvable:$true] %s15_s10 }
   0x4   :  { %s552_s11 = scalar_lea.vmem %s16_s10, 1024  ;;  %p557_p1 = scmp.lt.s32.totalorder %s16_s10, %s16_s10 }
   0x5   :  { %p553_p0 = scmp.ne.s32.totalorder %s16_s10, %s552_s11  ;;  %p558_p2 = scmp.lt.s32.totalorder %s552_s11, %s552_s11 }
   0x7   :  { %p559_p3 = por %p558_p2, %p557_p1 }
   0x9   :  { %p560_p4 = pnand %p559_p3, %p553_p0 }
   0xb   :  { %563 = shalt.err (!%p560_p4)
}
   0xc   :  { %s611_s12 = smov 64   ;;  %s612_s13 = smov 4  }
   0xd   :  { %21 = dma.hbm_to_vmem [thread:$0]  %s648_s0, 1024, %s16_s10, [#allocation3], %s611_s12, %s611_s12, %s612_s13  }
   0xe   :  { %s613_s16 = smov [#allocation5]  }
   0xf   :  { %s27_s17 = sshll.u32 %s613_s16, 4  ;;  %s28_s17 = int_to_ptr.vmem [resolvable:$true] %s27_s17 }
  0x10   :  { %s572_s18 = scalar_lea.vmem %s28_s17, 1024  ;;  %p577_p6 = scmp.lt.s32.totalorder %s28_s17, %s28_s17 }
  0x11   :  { %p573_p5 = scmp.ne.s32.totalorder %s28_s17, %s572_s18  ;;  %p578_p7 = scmp.lt.s32.totalorder %s572_s18, %s572_s18 }
  0x13   :  { %p579_p8 = por %p578_p7, %p577_p6 }
  0x15   :  { %p580_p9 = pnand %p579_p8, %p573_p5 }
  0x17   :  { %583 = shalt.err (!%p580_p9)
}
  0x18   :  { %33 = dma.hbm_to_vmem [thread:$0]  %s649_s1, 1024, %s28_s17, [#allocation6], %s611_s12, %s611_s12, %s612_s13  }
  0x19   :  { %604 = dma.done.wait [#allocation3], 1024  }
  0x1a   :  { %605 = vsyncadd [#allocation3], 4294966272 }
  0x1b   :  { %606 = dma.done.wait [#allocation6], 1024  }
  0x1c   :  { %607 = vsyncadd [#allocation6], 4294966272  ;;  %v528_v0 = vld [vmem:[#allocation5 + $0x38] sm:$0xff]   ;;  %v529_v1 = vld [vmem:[#allocation5 + $0x30] sm:$0xff]   ;;  %s614_s0 = smov [#allocation7]  }
  0x1d   :  { %475 = vmatprep.subr.bf16.mxu0 %v528_v0  ;;  %507 = vmatprep.subr.bf16.mxu1 %v528_v0  ;;  %v530_v2 = vld [vmem:[#allocation5 + $0x28] sm:$0xff]   ;;  %v531_v3 = vld [vmem:[#allocation5 + $0x20] sm:$0xff]   ;;  %v532_v6 = vld [vmem:[#allocation5 + $0x18] sm:$0xff]   ;;  %s351_s1 = sshll.u32 %s614_s0, 4  ;;  %s352_s1 = int_to_ptr.vmem [resolvable:$true] %s351_s1 }
  0x1e   :  { %476 = vmatpush3.bf16.msra.mxu0 %v528_v0  ;;  %515 = vmatpush3.bf16.msra.mxu1 %v528_v0  ;;  %v536_v4 = vld [vmem:[#allocation2] sm:$0xff]   ;;  %v533_v7 = vld [vmem:[#allocation5 + $0x10] sm:$0xff]   ;;  %v534_v8 = vld [vmem:[#allocation5 + $0x8] sm:$0xff]   ;;  %s584_s21 = scalar_lea.vmem %s352_s1, 1024  ;;  %p589_p11 = scmp.lt.s32.totalorder %s352_s1, %s352_s1 }
  0x1f   :  { %477 = vmatprep.subr.bf16.mxu0 %v529_v1  ;;  %508 = vmatprep.subr.bf16.mxu1 %v529_v1  ;;  %v537_v5 = vld [vmem:[#allocation2 + $0x20] sm:$0xff]   ;;  %v538_v10 = vld [vmem:[#allocation2 + $0x8] sm:$0xff]   ;;  %v540_v12 = vld [vmem:[#allocation2 + $0x10] sm:$0xff]   ;;  %p585_p10 = scmp.ne.s32.totalorder %s352_s1, %s584_s21  ;;  %p590_p12 = scmp.lt.s32.totalorder %s584_s21, %s584_s21 }
  0x20   :  { %491 = vmatprep.mubr.bf16.mxu0 %v536_v4  ;;  %499 = vmatprep.mubr.bf16.mxu1 %v537_v5  ;;  %v535_v9 = vld [vmem:[#allocation5] sm:$0xff]   ;;  %v539_v11 = vld [vmem:[#allocation2 + $0x28] sm:$0xff]   ;;  %v541_v13 = vld [vmem:[#allocation2 + $0x30] sm:$0xff]  }
  0x21   :  { %v542_v14 = vld [vmem:[#allocation2 + $0x18] sm:$0xff]   ;;  %p591_p13 = por %p590_p12, %p589_p11 }
  0x22   :  { %478 = vmatpush3.bf16.msra.mxu0 %v529_v1  ;;  %516 = vmatpush3.bf16.msra.mxu1 %v529_v1  ;;  %v543_v15 = vld [vmem:[#allocation2 + $0x38] sm:$0xff]  }
  0x23   :  { %479 = vmatprep.subr.bf16.mxu0 %v530_v2  ;;  %509 = vmatprep.subr.bf16.mxu1 %v530_v2  ;;  %p592_p0 = pnand %p591_p13, %p585_p10 }
  0x26   :  { %480 = vmatpush3.bf16.msra.mxu0 %v530_v2  ;;  %517 = vmatpush3.bf16.msra.mxu1 %v530_v2 }
  0x27   :  { %481 = vmatprep.subr.bf16.mxu0 %v531_v3  ;;  %510 = vmatprep.subr.bf16.mxu1 %v531_v3 }
  0x2a   :  { %482 = vmatpush3.bf16.msra.mxu0 %v531_v3  ;;  %518 = vmatpush3.bf16.msra.mxu1 %v531_v3 }
  0x2b   :  { %483 = vmatprep.subr.bf16.mxu0 %v532_v6  ;;  %511 = vmatprep.subr.bf16.mxu1 %v532_v6 }
  0x2e   :  { %484 = vmatpush3.bf16.msra.mxu0 %v532_v6  ;;  %519 = vmatpush3.bf16.msra.mxu1 %v532_v6 }
  0x2f   :  { %485 = vmatprep.subr.bf16.mxu0 %v533_v7  ;;  %512 = vmatprep.subr.bf16.mxu1 %v533_v7 }
  0x32   :  { %486 = vmatpush3.bf16.msra.mxu0 %v533_v7  ;;  %520 = vmatpush3.bf16.msra.mxu1 %v533_v7 }
  0x33   :  { %487 = vmatprep.subr.bf16.mxu0 %v534_v8  ;;  %513 = vmatprep.subr.bf16.mxu1 %v534_v8 }
  0x36   :  { %488 = vmatpush3.bf16.msra.mxu0 %v534_v8  ;;  %521 = vmatpush3.bf16.msra.mxu1 %v534_v8 }
  0x37   :  { %489 = vmatprep.subr.bf16.mxu0 %v535_v9  ;;  %514 = vmatprep.subr.bf16.mxu1 %v535_v9 }
  0x3a   :  { %490 = vmatpush3.bf16.msra.mxu0 %v535_v9  ;;  %522 = vmatpush3.bf16.msra.mxu1 %v535_v9 }
  0x3d   :  { %492 = vmatmul.mubr.bf16.vlgmr.msra.gmra.mxu0 %v538_v10  ;;  %500 = vmatmul.mubr.bf16.vlgmr.msra.gmra.mxu1 %v539_v11 }
  0x3e   :  { %495 = vmatprep.mubr.bf16.mxu0 %v540_v12  ;;  %503 = vmatprep.mubr.bf16.mxu1 %v541_v13 }
  0x45   :  { %496 = vmatmul.mubr.bf16.gmra.mxu0 %v542_v14  ;;  %504 = vmatmul.mubr.bf16.gmra.mxu1 %v543_v15 }
  0xfd   :  { %v493_v16 = vpop.f32.mrf.mxu0  ;;  %v501_v17 = vpop.f32.mrf.mxu1 }
  0xff   :  { %v203_v18 = vpop.f32.mrf.mxu0  ;;  %v235_v19 = vpop.f32.mrf.mxu1 }
 0x101   :  { %v494_v20 = vpop.f32.mrf.mxu0  ;;  %v502_v21 = vpop.f32.mrf.mxu1 }
 0x102   :  { %v420_v22 = vpack.c.bf16 %v494_v20, %v493_v16  ;;  %v440_v23 = vpack.c.bf16 %v502_v21, %v501_v17 }
 0x103   :  { %v206_v24 = vpop.f32.mrf.mxu0  ;;  %v238_v25 = vpop.f32.mrf.mxu1 }
 0x104   :  { %452 = vst [vmem:[#allocation7 + $0x8] sm:$0xff] %v420_v22   ;;  %456 = vst [vmem:[#allocation7 + $0x28] sm:$0xff] %v440_v23   ;;  %v415_v26 = vpack.c.bf16 %v206_v24, %v203_v18  ;;  %v435_v27 = vpack.c.bf16 %v238_v25, %v235_v19 }
 0x105   :  { %v497_v28 = vpop.f32.mrf.mxu0  ;;  %v505_v29 = vpop.f32.mrf.mxu1 }
 0x106   :  { %416 = vst [vmem:[#allocation7] sm:$0xff] %v415_v26   ;;  %455 = vst [vmem:[#allocation7 + $0x20] sm:$0xff] %v435_v27  }
 0x107   :  { %v219_v30 = vpop.f32.mrf.mxu0  ;;  %v251_v31 = vpop.f32.mrf.mxu1 }
 0x109   :  { %v498_v32 = vpop.f32.mrf.mxu0  ;;  %v506_v33 = vpop.f32.mrf.mxu1 }
 0x10a   :  { %v430_v34 = vpack.c.bf16 %v498_v32, %v497_v28  ;;  %v450_v35 = vpack.c.bf16 %v506_v33, %v505_v29 }
 0x10b   :  { %v222_v36 = vpop.f32.mrf.mxu0  ;;  %v254_v37 = vpop.f32.mrf.mxu1 }
 0x10c   :  { %454 = vst [vmem:[#allocation7 + $0x18] sm:$0xff] %v430_v34   ;;  %458 = vst [vmem:[#allocation7 + $0x38] sm:$0xff] %v450_v35   ;;  %v425_v38 = vpack.c.bf16 %v222_v36, %v219_v30  ;;  %v445_v39 = vpack.c.bf16 %v254_v37, %v251_v31 }
 0x10e   :  { %453 = vst [vmem:[#allocation7 + $0x10] sm:$0xff] %v425_v38   ;;  %457 = vst [vmem:[#allocation7 + $0x30] sm:$0xff] %v445_v39  }
 0x10f   :  { %595 = shalt.err (!%p592_p0)
}
 0x110   :  { %357 = dma.vmem_to_hbm [thread:$0]  %s352_s1, 1024, %s650_s2, [#allocation4], %s611_s12, %s611_s12, %s612_s13  }
 0x111   :  { %608 = dma.done.wait [#allocation4], 1024  }
 0x112   :  { %609 = vsyncadd [#allocation4], 4294966272 }
 0x113   :  { %361 = vsyncpa [#allocation3], 1 }
 0x114   :  { %362 = vsyncpa [#allocation6], 1 }
 0x115   :  { %363 = vsyncpa [#allocation4], 1 }

</bundles_post_ra>
